<compile_context>
chip_gen: v7x
topology: tpu7x:2x2x1
jax: 0.10.0
libtpu: 0.0.40
codegen_flags: <defaults>
</compile_context>

<pallas_src>
import jax
import jax.numpy as jnp
from jax.experimental import pallas as pl
from jax.experimental.pallas import tpu as pltpu


def _round_up(n, m):
    return ((n + m - 1) // m) * m


def mlp_kernel(x_ref, w1_ref, b1_ref, w2_ref, b2_ref, w3_ref, b3_ref, o_ref):
    # In-kernel bf16 cast (x arrives as f32 straight from HBM; no wrapper pass).
    x = x_ref[...].astype(jnp.bfloat16)
    # Layer 1: (tb, 1024)bf16 @ (1024, 256)bf16 -> f32 acc, +b1, ReLU
    h = jnp.dot(x, w1_ref[...], preferred_element_type=jnp.float32)
    h = jnp.maximum(h + b1_ref[...], 0.0)
    # Layer 2: (tb, 256) @ (256, 128) -> f32 acc, +b2, ReLU
    h = jnp.dot(h.astype(jnp.bfloat16), w2_ref[...],
                preferred_element_type=jnp.float32)
    h = jnp.maximum(h + b2_ref[...], 0.0)
    # Layer 3: (tb, 128) @ (128, 64) -> f32 acc, +b3 (lane-masked 64-wide store)
    h = jnp.dot(h.astype(jnp.bfloat16), w3_ref[...],
                preferred_element_type=jnp.float32)
    o_ref[...] = (h + b3_ref[...]).astype(o_ref.dtype)


def prepare_params(params):
    """One-time glue: transpose (out,in)->(in,out), bf16 weights, f32 (1,N) biases."""
    w1 = params["w1"].T.astype(jnp.bfloat16)          # (1024, 256)
    w2 = params["w2"].T.astype(jnp.bfloat16)          # (256, 128)
    w3 = params["w3"].T.astype(jnp.bfloat16)          # (128, 64)  (no padding)
    b1 = params["b1"][None, :].astype(jnp.float32)    # (1, 256)
    b2 = params["b2"][None, :].astype(jnp.float32)    # (1, 128)
    b3 = params["b3"][None, :].astype(jnp.float32)    # (1, 64)
    return (w1, b1, w2, b2, w3, b3)


def downstream_task_forward(x, prepared, *, tb=512):
    """x: (B, 1024) float32. prepared: output of prepare_params. Returns (B, 64) f32."""
    B, D_in = x.shape
    assert D_in == 1024

    # Large tile to amortize per-step overhead and hit the HBM roofline; shrink
    # for small batches (rounded up to a sublane-friendly multiple of 16).
    # TODO(synk): on v7x (2 TensorCores) prefer an even >=2-step grid for moderate B.
    tb = max(8, min(int(tb), _round_up(B, 16)))
    grid = pl.cdiv(B, tb)  # ragged last tile handled by Pallas (rows independent)

    w1, b1, w2, b2, w3, b3 = prepared
    resident = lambda i: (0, 0)

    out = pl.pallas_call(
        mlp_kernel,
        out_shape=jax.ShapeDtypeStruct((B, 64), jnp.float32),
        grid_spec=pltpu.PrefetchScalarGridSpec(
            num_scalar_prefetch=0,
            grid=(grid,),
            in_specs=[
                pl.BlockSpec((tb, 1024), lambda i: (i, 0)),  # x tile (f32, streamed)
                pl.BlockSpec((1024, 256), resident),         # w1 (resident in VMEM)
                pl.BlockSpec((1, 256), resident),            # b1
                pl.BlockSpec((256, 128), resident),          # w2
                pl.BlockSpec((1, 128), resident),            # b2
                pl.BlockSpec((128, 64), resident),           # w3
                pl.BlockSpec((1, 64), resident),             # b3
            ],
            out_specs=pl.BlockSpec((tb, 64), lambda i: (i, 0)),
        ),
        compiler_params=pltpu.CompilerParams(
            dimension_semantics=("parallel",),
        ),
    )(x, w1, b1, w2, b2, w3, b3)

    return out


def init_params(key):
    """Deterministic synthetic parameters (PyTorch Linear convention: W is (out, in))."""
    ks = jax.random.split(key, 6)

    def lin(kw, kb, out_f, in_f):
        bound = 1.0 / jnp.sqrt(in_f)
        w = jax.random.uniform(kw, (out_f, in_f), jnp.float32, -bound, bound)
        b = jax.random.uniform(kb, (out_f,), jnp.float32, -bound, bound)
        return w, b

    w1, b1 = lin(ks[0], ks[1], 256, 1024)
    w2, b2 = lin(ks[2], ks[3], 128, 256)
    w3, b3 = lin(ks[4], ks[5], 64, 128)
    return {"w1": w1, "b1": b1, "w2": w2, "b2": b2, "w3": w3, "b3": b3}


def reference_forward(x, p):
    h = jnp.maximum(x @ p["w1"].T + p["b1"], 0.0)
    h = jnp.maximum(h @ p["w2"].T + p["b2"], 0.0)
    return h @ p["w3"].T + p["b3"]


if __name__ == "__main__":
    key = jax.random.PRNGKey(0)
    k_x, k_p = jax.random.split(key)
    B = 32  # small test batch
    x = jax.random.normal(k_x, (B, 1024), jnp.float32)
    params = init_params(k_p)
    prepared = prepare_params(params)

    fwd = jax.jit(downstream_task_forward)
    out = jax.block_until_ready(fwd(x, prepared))

    ref = reference_forward(x, params)
    assert out.shape == (B, 64)
    # Tolerance loosened vs. f32 reference because the MXU path uses bf16
    # inputs with f32 accumulation (K up to 1024).
    assert jnp.allclose(out, ref, atol=3e-2, rtol=3e-2), (
        float(jnp.max(jnp.abs(out - ref))))
    print("KERNEL_OK")
</pallas_src>

<mosaic_0001>
module attributes {stable_mosaic.version = 11 : i64} {
  func.func @mlp_kernel(%arg0: i32, %arg1: memref<32x1024xf32, #tpu.memory_space<vmem>>, %arg2: memref<1024x256xbf16, #tpu.memory_space<vmem>>, %arg3: memref<1x256xf32, #tpu.memory_space<vmem>>, %arg4: memref<256x128xbf16, #tpu.memory_space<vmem>>, %arg5: memref<1x128xf32, #tpu.memory_space<vmem>>, %arg6: memref<128x64xbf16, #tpu.memory_space<vmem>>, %arg7: memref<1x64xf32, #tpu.memory_space<vmem>>, %arg8: memref<32x64xf32, #tpu.memory_space<vmem>>) attributes {dimension_semantics = [#tpu.dimension_semantics<parallel>], iteration_bounds = array<i64: 1>, scalar_prefetch = 0 : i64, scratch_operands = 0 : i64, tpu.core_type = #tpu.core_type<tc>, window_params = [{transform_indices = @transform_0, window_bounds = array<i64: 32, 1024>}, {pipeline_mode = #tpu.pipeline_mode<synchronous>, transform_indices = @transform_1, window_bounds = array<i64: 1024, 256>}, {pipeline_mode = #tpu.pipeline_mode<synchronous>, transform_indices = @transform_2, window_bounds = array<i64: 1, 256>}, {pipeline_mode = #tpu.pipeline_mode<synchronous>, transform_indices = @transform_3, window_bounds = array<i64: 256, 128>}, {pipeline_mode = #tpu.pipeline_mode<synchronous>, transform_indices = @transform_4, window_bounds = array<i64: 1, 128>}, {pipeline_mode = #tpu.pipeline_mode<synchronous>, transform_indices = @transform_5, window_bounds = array<i64: 128, 64>}, {pipeline_mode = #tpu.pipeline_mode<synchronous>, transform_indices = @transform_6, window_bounds = array<i64: 1, 64>}, {transform_indices = @transform_7, window_bounds = array<i64: 32, 64>}]} {
    %c0 = arith.constant 0 : index
    %c0_0 = arith.constant 0 : index
    %0 = vector.load %arg1[%c0, %c0_0] : memref<32x1024xf32, #tpu.memory_space<vmem>>, vector<32x1024xf32>
    %1 = arith.truncf %0 : vector<32x1024xf32> to vector<32x1024xbf16>
    %c0_1 = arith.constant 0 : index
    %c0_2 = arith.constant 0 : index
    %2 = vector.load %arg2[%c0_1, %c0_2] : memref<1024x256xbf16, #tpu.memory_space<vmem>>, vector<1024x256xbf16>
    %cst = arith.constant dense<0.000000e+00> : vector<32x256xf32>
    %3 = tpu.matmul %1, %2, %cst {dimension_numbers = #tpu.dot_dimension_numbers<[1], [0], [0], [1], [0, 0, 1, 1], [], []>} : vector<32x1024xbf16>, vector<1024x256xbf16>, vector<32x256xf32> -> vector<32x256xf32>
    %c0_3 = arith.constant 0 : index
    %c0_4 = arith.constant 0 : index
    %4 = vector.load %arg3[%c0_3, %c0_4] : memref<1x256xf32, #tpu.memory_space<vmem>>, vector<1x256xf32>
    %5 = vector.broadcast %4 : vector<1x256xf32> to vector<32x256xf32>
    %6 = arith.addf %3, %5 : vector<32x256xf32>
    %cst_5 = arith.constant 0.000000e+00 : f32
    %7 = vector.broadcast %cst_5 : f32 to vector<32x256xf32>
    %8 = arith.maximumf %6, %7 : vector<32x256xf32>
    %9 = arith.truncf %8 : vector<32x256xf32> to vector<32x256xbf16>
    %c0_6 = arith.constant 0 : index
    %c0_7 = arith.constant 0 : index
    %10 = vector.load %arg4[%c0_6, %c0_7] : memref<256x128xbf16, #tpu.memory_space<vmem>>, vector<256x128xbf16>
    %cst_8 = arith.constant dense<0.000000e+00> : vector<32x128xf32>
    %11 = tpu.matmul %9, %10, %cst_8 {dimension_numbers = #tpu.dot_dimension_numbers<[1], [0], [0], [1], [0, 0, 1, 1], [], []>} : vector<32x256xbf16>, vector<256x128xbf16>, vector<32x128xf32> -> vector<32x128xf32>
    %c0_9 = arith.constant 0 : index
    %c0_10 = arith.constant 0 : index
    %12 = vector.load %arg5[%c0_9, %c0_10] : memref<1x128xf32, #tpu.memory_space<vmem>>, vector<1x128xf32>
    %13 = vector.broadcast %12 : vector<1x128xf32> to vector<32x128xf32>
    %14 = arith.addf %11, %13 : vector<32x128xf32>
    %cst_11 = arith.constant 0.000000e+00 : f32
    %15 = vector.broadcast %cst_11 : f32 to vector<32x128xf32>
    %16 = arith.maximumf %14, %15 : vector<32x128xf32>
    %17 = arith.truncf %16 : vector<32x128xf32> to vector<32x128xbf16>
    %c0_12 = arith.constant 0 : index
    %c0_13 = arith.constant 0 : index
    %18 = vector.load %arg6[%c0_12, %c0_13] : memref<128x64xbf16, #tpu.memory_space<vmem>>, vector<128x64xbf16>
    %cst_14 = arith.constant dense<0.000000e+00> : vector<32x64xf32>
    %19 = tpu.matmul %17, %18, %cst_14 {dimension_numbers = #tpu.dot_dimension_numbers<[1], [0], [0], [1], [0, 0, 1, 1], [], []>} : vector<32x128xbf16>, vector<128x64xbf16>, vector<32x64xf32> -> vector<32x64xf32>
    %c0_15 = arith.constant 0 : index
    %c0_16 = arith.constant 0 : index
    %20 = vector.load %arg7[%c0_15, %c0_16] : memref<1x64xf32, #tpu.memory_space<vmem>>, vector<1x64xf32>
    %21 = vector.broadcast %20 : vector<1x64xf32> to vector<32x64xf32>
    %22 = arith.addf %19, %21 : vector<32x64xf32>
    %c0_17 = arith.constant 0 : index
    %c0_18 = arith.constant 0 : index
    %23 = vector.load %arg8[%c0_17, %c0_18] : memref<32x64xf32, #tpu.memory_space<vmem>>, vector<32x64xf32>
    tpu.vector_store %arg8[%c0_17, %c0_18], %22 {strides = array<i32>} : memref<32x64xf32, #tpu.memory_space<vmem>>, vector<32x64xf32>,
    return
  }
  func.func @transform_0(%arg0: i32) -> (i32, i32) {
    %c0_i32 = arith.constant 0 : i32
    %c0_i32_0 = arith.constant 0 : i32
    return %arg0, %c0_i32 : i32, i32
  }
  func.func @transform_1(%arg0: i32) -> (i32, i32) {
    %c0_i32 = arith.constant 0 : i32
    %c0_i32_0 = arith.constant 0 : i32
    %c0_i32_1 = arith.constant 0 : i32
    return %c0_i32, %c0_i32_0 : i32, i32
  }
  func.func @transform_2(%arg0: i32) -> (i32, i32) {
    %c0_i32 = arith.constant 0 : i32
    %c0_i32_0 = arith.constant 0 : i32
    %c0_i32_1 = arith.constant 0 : i32
    return %c0_i32, %c0_i32_0 : i32, i32
  }
  func.func @transform_3(%arg0: i32) -> (i32, i32) {
    %c0_i32 = arith.constant 0 : i32
    %c0_i32_0 = arith.constant 0 : i32
    %c0_i32_1 = arith.constant 0 : i32
    return %c0_i32, %c0_i32_0 : i32, i32
  }
  func.func @transform_4(%arg0: i32) -> (i32, i32) {
    %c0_i32 = arith.constant 0 : i32
    %c0_i32_0 = arith.constant 0 : i32
    %c0_i32_1 = arith.constant 0 : i32
    return %c0_i32, %c0_i32_0 : i32, i32
  }
  func.func @transform_5(%arg0: i32) -> (i32, i32) {
    %c0_i32 = arith.constant 0 : i32
    %c0_i32_0 = arith.constant 0 : i32
    %c0_i32_1 = arith.constant 0 : i32
    return %c0_i32, %c0_i32_0 : i32, i32
  }
  func.func @transform_6(%arg0: i32) -> (i32, i32) {
    %c0_i32 = arith.constant 0 : i32
    %c0_i32_0 = arith.constant 0 : i32
    %c0_i32_1 = arith.constant 0 : i32
    return %c0_i32, %c0_i32_0 : i32, i32
  }
  func.func @transform_7(%arg0: i32) -> (i32, i32) {
    %c0_i32 = arith.constant 0 : i32
    %c0_i32_0 = arith.constant 0 : i32
    return %arg0, %c0_i32 : i32, i32
  }
}

</mosaic_0001>

<bundles_post_ra>
// kernel: downstream_task_forward.1
= control target key start
LH: loop header
LB: loop body
LE: loop exit
PB: predicated region body
PF: predicated region fallthrough
CT: control target
= control target key end

     0   :  { %12 = vsyncpa [#allocation3], 0  ;;  %s2153_s0 = inlined_call_operand.hbm [shape: f32[32,1024], index: 0, kind: input, shape index: {}]   ;;  %s2154_s1 = inlined_call_operand.hbm [shape: bf16[1024,256], index: 1, kind: input, shape index: {}]   ;;  %s2155_s2 = inlined_call_operand.vmem [shape: f32[1,256], index: 2, kind: input, shape index: {}]   ;;  %s2156_s3 = inlined_call_operand.hbm [shape: bf16[256,128], index: 3, kind: input, shape index: {}]   ;;  %s2157_s4 = inlined_call_operand.vmem [shape: f32[1,128], index: 4, kind: input, shape index: {}]   ;;  %s2158_s5 = inlined_call_operand.vmem [shape: bf16[128,64], index: 5, kind: input, shape index: {}]   ;;  %s2159_s6 = inlined_call_operand.vmem [shape: f32[1,64], index: 6, kind: input, shape index: {}]   ;;  %s2160_s7 = inlined_call_operand.hbm [shape: f32[32,64], index: 7, kind: output, shape index: {}]  }
   0x1   :  { %13 = vsyncpa [#allocation6], 0 }
   0x2   :  { %14 = vsyncpa [#allocation4], 0  ;;  %s2017_s24 = smov [#allocation5]   ;;  %s1923_s28 = scalar_lea.hbm %s2154_s1, 16384 }
   0x3   :  { %s32_s25 = sshll.u32 %s2017_s24, 4  ;;  %p1924_p0 = scmp.ne.s32.totalorder %s2154_s1, %s1923_s28  ;;  %s33_s25 = int_to_ptr.vmem [resolvable:$true] %s32_s25 }
   0x4   :  { %p1927_p1 = scmp.lt.u32.totalorder %s1923_s28, %s2154_s1 }
   0x6   :  { %p1929_p2 = pnand %p1927_p1, %p1924_p0 }
   0x8   :  { %1932 = shalt.err (!%p1929_p2)
}
   0x9   :  { %s1933_s10 = scalar_lea.vmem %s33_s25, 16384  ;;  %p1938_p4 = scmp.lt.s32.totalorder %s33_s25, %s33_s25 }
   0xa   :  { %p1934_p3 = scmp.ne.s32.totalorder %s33_s25, %s1933_s10  ;;  %p1939_p5 = scmp.lt.s32.totalorder %s1933_s10, %s1933_s10 }
   0xc   :  { %p1940_p6 = por %p1939_p5, %p1938_p4 }
   0xe   :  { %p1941_p7 = pnand %p1940_p6, %p1934_p3 }
  0x10   :  { %1944 = shalt.err (!%p1941_p7)
}
  0x11   :  { %s2018_s11 = smov 128   ;;  %s2019_s12 = smov 8  }
  0x12   :  { %38 = dma.hbm_to_vmem [thread:$0]  %s2154_s1, 16384, %s33_s25, [#allocation6], %s2018_s11, %s2018_s11, %s2019_s12  }
  0x13   :  { %s2020_s15 = smov [#allocation2]   ;;  %s1945_s19 = scalar_lea.hbm %s2153_s0, 4096 }
  0x14   :  { %s20_s16 = sshll.u32 %s2020_s15, 4  ;;  %p1946_p8 = scmp.ne.s32.totalorder %s2153_s0, %s1945_s19  ;;  %s21_s16 = int_to_ptr.vmem [resolvable:$true] %s20_s16 }
  0x15   :  { %p1949_p9 = scmp.lt.u32.totalorder %s1945_s19, %s2153_s0 }
  0x17   :  { %p1951_p10 = pnand %p1949_p9, %p1946_p8 }
  0x19   :  { %1954 = shalt.err (!%p1951_p10)
}
  0x1a   :  { %s1955_s24 = scalar_lea.vmem %s21_s16, 4096  ;;  %p1960_p12 = scmp.lt.s32.totalorder %s21_s16, %s21_s16 }
  0x1b   :  { %p1956_p11 = scmp.ne.s32.totalorder %s21_s16, %s1955_s24  ;;  %p1961_p13 = scmp.lt.s32.totalorder %s1955_s24, %s1955_s24 }
  0x1d   :  { %p1962_p0 = por %p1961_p13, %p1960_p12 }
  0x1f   :  { %p1963_p1 = pnand %p1962_p0, %p1956_p11 }
  0x21   :  { %1966 = shalt.err (!%p1963_p1)
}
  0x22   :  { %s2021_s1 = smov 1024   ;;  %s2022_s25 = smov 64  }
  0x23   :  { %26 = dma.hbm_to_vmem [thread:$0]  %s2153_s0, 4096, %s21_s16, [#allocation3], %s2021_s1, %s2021_s1, %s2022_s25  }
  0x24   :  { %s2023_s28 = smov [#allocation7]   ;;  %s1967_s9 = scalar_lea.hbm %s2156_s3, 2048 }
  0x25   :  { %s46_s29 = sshll.u32 %s2023_s28, 4  ;;  %p1968_p2 = scmp.ne.s32.totalorder %s2156_s3, %s1967_s9  ;;  %s47_s29 = int_to_ptr.vmem [resolvable:$true] %s46_s29 }
  0x26   :  { %p1971_p3 = scmp.lt.u32.totalorder %s1967_s9, %s2156_s3 }
  0x28   :  { %p1973_p4 = pnand %p1971_p3, %p1968_p2 }
  0x2a   :  { %1976 = shalt.err (!%p1973_p4)
}
  0x2b   :  { %s1977_s17 = scalar_lea.vmem %s47_s29, 2048  ;;  %p1982_p6 = scmp.lt.s32.totalorder %s47_s29, %s47_s29 }
  0x2c   :  { %p1978_p5 = scmp.ne.s32.totalorder %s47_s29, %s1977_s17  ;;  %p1983_p7 = scmp.lt.s32.totalorder %s1977_s17, %s1977_s17 }
  0x2e   :  { %p1984_p8 = por %p1983_p7, %p1982_p6 }
  0x30   :  { %p1985_p9 = pnand %p1984_p8, %p1978_p5 }
  0x32   :  { %1988 = shalt.err (!%p1985_p9)
}
  0x33   :  { %s2024_s0 = smov 4  }
  0x34   :  { %52 = dma.hbm_to_vmem [thread:$0]  %s2156_s3, 2048, %s47_s29, [#allocation6], %s2022_s25, %s2022_s25, %s2024_s0  }
  0x35   :  { %2011 = dma.done.wait [#allocation3], 4096  }
  0x36   :  { %2012 = vsyncadd [#allocation3], 4294963200 }
  0x37   :  { %2013 = dma.done.wait [#allocation6], 18432  }
  0x38   :  { %2014 = vsyncadd [#allocation6], 4294948864  ;;  %v1707_v0 = vld [vmem:[#allocation5 + $0x4] ss:$8 sps:$4 sm:$0xff]   ;;  %v1711_v2 = vld [vmem:[#allocation5] ss:$8 sps:$4 sm:$0xff]  }
  0x39   :  { %v1709_v1 = vld [vmem:[#allocation5 + $0x204] ss:$8 sps:$4 sm:$0xff]   ;;  %897 = vmatprep.subr.bf16.mxu1 %v1707_v0  ;;  %v1712_v3 = vld [vmem:[#allocation5 + $0x200] ss:$8 sps:$4 sm:$0xff]   ;;  %v1713_v4 = vld [vmem:[#allocation5 + $0x14] ss:$8 sps:$4 sm:$0xff]  }
  0x3a   :  { %1003 = vmatprep.subr.bf16.mxu0 %v1709_v1  ;;  %898 = vmatpush1.bf16.msra.mxu1 %v1711_v2  ;;  %v1715_v5 = vld [vmem:[#allocation5 + $0x214] ss:$8 sps:$4 sm:$0xff]   ;;  %v1717_v6 = vld [vmem:[#allocation5 + $0x10] ss:$8 sps:$4 sm:$0xff]   ;;  %v1719_v8 = vld [vmem:[#allocation5 + $0x24] ss:$8 sps:$4 sm:$0xff]  }
  0x3b   :  { %1004 = vmatpush1.bf16.msra.mxu0 %v1712_v3  ;;  %899 = vmatprep.subr.bf16.mxu1 %v1713_v4  ;;  %v1718_v7 = vld [vmem:[#allocation5 + $0x210] ss:$8 sps:$4 sm:$0xff]   ;;  %v1721_v9 = vld [vmem:[#allocation5 + $0x224] ss:$8 sps:$4 sm:$0xff]   ;;  %v1723_v10 = vld [vmem:[#allocation5 + $0x20] ss:$8 sps:$4 sm:$0xff]  }
  0x3c   :  { %1005 = vmatprep.subr.bf16.mxu0 %v1715_v5  ;;  %v1724_v11 = vld [vmem:[#allocation5 + $0x220] ss:$8 sps:$4 sm:$0xff]   ;;  %v1725_v12 = vld [vmem:[#allocation5 + $0x34] ss:$8 sps:$4 sm:$0xff]   ;;  %v1729_v14 = vld [vmem:[#allocation5 + $0x30] ss:$8 sps:$4 sm:$0xff]  }
  0x3d   :  { %v1727_v13 = vld [vmem:[#allocation5 + $0x234] ss:$8 sps:$4 sm:$0xff]   ;;  %v1730_v15 = vld [vmem:[#allocation5 + $0x230] ss:$8 sps:$4 sm:$0xff]   ;;  %v1731_v16 = vld [vmem:[#allocation5 + $0x44] ss:$8 sps:$4 sm:$0xff]  }
  0x3e   :  { %900 = vmatpush1.bf16.msra.mxu1 %v1717_v6  ;;  %v1733_v17 = vld [vmem:[#allocation5 + $0x244] ss:$8 sps:$4 sm:$0xff]   ;;  %v1735_v18 = vld [vmem:[#allocation5 + $0x40] ss:$8 sps:$4 sm:$0xff]   ;;  %v1737_v20 = vld [vmem:[#allocation5 + $0x54] ss:$8 sps:$4 sm:$0xff]  }
  0x3f   :  { %1006 = vmatpush1.bf16.msra.mxu0 %v1718_v7  ;;  %901 = vmatprep.subr.bf16.mxu1 %v1719_v8  ;;  %v1736_v19 = vld [vmem:[#allocation5 + $0x240] ss:$8 sps:$4 sm:$0xff]   ;;  %v1739_v21 = vld [vmem:[#allocation5 + $0x254] ss:$8 sps:$4 sm:$0xff]   ;;  %v1741_v22 = vld [vmem:[#allocation5 + $0x50] ss:$8 sps:$4 sm:$0xff]  }
  0x40   :  { %1007 = vmatprep.subr.bf16.mxu0 %v1721_v9  ;;  %v1742_v23 = vld [vmem:[#allocation5 + $0x250] ss:$8 sps:$4 sm:$0xff]   ;;  %v1743_v24 = vld [vmem:[#allocation5 + $0x64] ss:$8 sps:$4 sm:$0xff]   ;;  %v1747_v26 = vld [vmem:[#allocation5 + $0x60] ss:$8 sps:$4 sm:$0xff]  }
  0x41   :  { %v1745_v25 = vld [vmem:[#allocation5 + $0x264] ss:$8 sps:$4 sm:$0xff]   ;;  %v1748_v27 = vld [vmem:[#allocation5 + $0x260] ss:$8 sps:$4 sm:$0xff]   ;;  %v1749_v28 = vld [vmem:[#allocation5 + $0x74] ss:$8 sps:$4 sm:$0xff]  }
  0x42   :  { %902 = vmatpush1.bf16.msra.mxu1 %v1723_v10  ;;  %v1751_v29 = vld [vmem:[#allocation5 + $0x274] ss:$8 sps:$4 sm:$0xff]   ;;  %v1753_v30 = vld [vmem:[#allocation5 + $0x70] ss:$8 sps:$4 sm:$0xff]   ;;  %v1755_v32 = vld [vmem:[#allocation5 + $0x84] ss:$8 sps:$4 sm:$0xff]  }
  0x43   :  { %1008 = vmatpush1.bf16.msra.mxu0 %v1724_v11  ;;  %903 = vmatprep.subr.bf16.mxu1 %v1725_v12  ;;  %v1754_v31 = vld [vmem:[#allocation5 + $0x270] ss:$8 sps:$4 sm:$0xff]   ;;  %v1757_v33 = vld [vmem:[#allocation5 + $0x284] ss:$8 sps:$4 sm:$0xff]   ;;  %v1759_v34 = vld [vmem:[#allocation5 + $0x80] ss:$8 sps:$4 sm:$0xff]  }
  0x44   :  { %1009 = vmatprep.subr.bf16.mxu0 %v1727_v13  ;;  %v1760_v35 = vld [vmem:[#allocation5 + $0x280] ss:$8 sps:$4 sm:$0xff]   ;;  %v1761_v36 = vld [vmem:[#allocation5 + $0x94] ss:$8 sps:$4 sm:$0xff]   ;;  %v1765_v38 = vld [vmem:[#allocation5 + $0x90] ss:$8 sps:$4 sm:$0xff]  }
  0x45   :  { %v1763_v37 = vld [vmem:[#allocation5 + $0x294] ss:$8 sps:$4 sm:$0xff]   ;;  %v1766_v39 = vld [vmem:[#allocation5 + $0x290] ss:$8 sps:$4 sm:$0xff]   ;;  %v1767_v40 = vld [vmem:[#allocation5 + $0xa4] ss:$8 sps:$4 sm:$0xff]  }
  0x46   :  { %904 = vmatpush1.bf16.msra.mxu1 %v1729_v14  ;;  %v1769_v41 = vld [vmem:[#allocation5 + $0x2a4] ss:$8 sps:$4 sm:$0xff]   ;;  %v1771_v42 = vld [vmem:[#allocation5 + $0xa0] ss:$8 sps:$4 sm:$0xff]   ;;  %v1773_v44 = vld [vmem:[#allocation5 + $0xb4] ss:$8 sps:$4 sm:$0xff]  }
  0x47   :  { %1010 = vmatpush1.bf16.msra.mxu0 %v1730_v15  ;;  %905 = vmatprep.subr.bf16.mxu1 %v1731_v16  ;;  %v1772_v43 = vld [vmem:[#allocation5 + $0x2a0] ss:$8 sps:$4 sm:$0xff]   ;;  %v1775_v45 = vld [vmem:[#allocation5 + $0x2b4] ss:$8 sps:$4 sm:$0xff]   ;;  %v1777_v46 = vld [vmem:[#allocation5 + $0xb0] ss:$8 sps:$4 sm:$0xff]  }
  0x48   :  { %1011 = vmatprep.subr.bf16.mxu0 %v1733_v17  ;;  %v1778_v47 = vld [vmem:[#allocation5 + $0x2b0] ss:$8 sps:$4 sm:$0xff]   ;;  %v70_v48 = vld [vmem:[#allocation2 + $0x8] sm:$0xff]  ;;  %v1785_v58 = vld [vmem:[#allocation5 + $0xd4] ss:$8 sps:$4 sm:$0xff]   ;;  %vm1431_vm0 = vcmask 523264  }
  0x49   :  { %v78_v49 = vld [vmem:[#allocation2 + $0x48] sm:$0xff]  ;;  %v1787_v59 = vld [vmem:[#allocation5 + $0x2d4] ss:$8 sps:$4 sm:$0xff]   ;;  %v1789_v60 = vld [vmem:[#allocation5 + $0xd0] ss:$8 sps:$4 sm:$0xff]   ;;  %s2025_s15 = smov [#allocation8]  }
  0x4a   :  { %906 = vmatpush1.bf16.msra.mxu1 %v1735_v18  ;;  %v1779_v50 = vld [vmem:[#allocation5 + $0xc4] ss:$8 sps:$4 sm:$0xff]   ;;  %v102_v52 = vpack.c.bf16 %v78_v49, %v70_v48  ;;  %v1783_v56 = vld [vmem:[#allocation5 + $0xc0] ss:$8 sps:$4 sm:$0xff]   ;;  %v1790_v61 = vld [vmem:[#allocation5 + $0x2d0] ss:$8 sps:$4 sm:$0xff]  }
  0x4b   :  { %1012 = vmatpush1.bf16.msra.mxu0 %v1736_v19  ;;  %907 = vmatprep.subr.bf16.mxu1 %v1737_v20  ;;  %v1781_v51 = vld [vmem:[#allocation5 + $0x2c4] ss:$8 sps:$4 sm:$0xff]   ;;  %v1784_v57 = vld [vmem:[#allocation5 + $0x2c0] ss:$8 sps:$4 sm:$0xff]   ;;  %v1797_v2 = vld [vmem:[#allocation5 + $0xf4] ss:$8 sps:$4 sm:$0xff]  }
  0x4c   :  { %1013 = vmatprep.subr.bf16.mxu0 %v1739_v21  ;;  %v74_v53 = vld [vmem:[#allocation2 + $0x28] sm:$0xff]  ;;  %929 = vmatprep.mubr.bf16.mxu1 %v102_v52  ;;  %v1799_v3 = vld [vmem:[#allocation5 + $0x2f4] ss:$8 sps:$4 sm:$0xff]   ;;  %v1801_v4 = vld [vmem:[#allocation5 + $0xf0] ss:$8 sps:$4 sm:$0xff]   ;;  %s1441_s17 = sshll.u32 %s2025_s15, 4  ;;  %s1442_s17 = int_to_ptr.vmem [resolvable:$true] %s1441_s17 }
  0x4d   :  { %v82_v54 = vld [vmem:[#allocation2 + $0x68] sm:$0xff]  ;;  %v1802_v5 = vld [vmem:[#allocation5 + $0x2f0] ss:$8 sps:$4 sm:$0xff]   ;;  %v69_v6 = vld [vmem:[#allocation2] sm:$0xff]  ;;  %s1989_s0 = scalar_lea.vmem %s1442_s17, 512  ;;  %p1994_p11 = scmp.lt.s32.totalorder %s1442_s17, %s1442_s17 }
  0x4e   :  { %908 = vmatpush1.bf16.msra.mxu1 %v1741_v22  ;;  %v106_v55 = vpack.c.bf16 %v82_v54, %v74_v53  ;;  %v1791_v62 = vld [vmem:[#allocation5 + $0xe4] ss:$8 sps:$4 sm:$0xff]   ;;  %v1795_v0 = vld [vmem:[#allocation5 + $0xe0] ss:$8 sps:$4 sm:$0xff]   ;;  %v1811_v16 = vld [vmem:[#allocation5 + $0x114] ss:$8 sps:$4 sm:$0xff]   ;;  %p1990_p10 = scmp.ne.s32.totalorder %s1442_s17, %s1989_s0  ;;  %p1995_p12 = scmp.lt.s32.totalorder %s1989_s0, %s1989_s0 }
  0x4f   :  { %1014 = vmatpush1.bf16.msra.mxu0 %v1742_v23  ;;  %909 = vmatprep.subr.bf16.mxu1 %v1743_v24  ;;  %v1793_v63 = vld [vmem:[#allocation5 + $0x2e4] ss:$8 sps:$4 sm:$0xff]   ;;  %v1796_v1 = vld [vmem:[#allocation5 + $0x2e0] ss:$8 sps:$4 sm:$0xff]   ;;  %v1814_v17 = vld [vmem:[#allocation5 + $0x314] ss:$8 sps:$4 sm:$0xff]  }
  0x50   :  { %1015 = vmatprep.subr.bf16.mxu0 %v1745_v25  ;;  %1035 = vmatprep.mubr.bf16.mxu0 %v106_v55  ;;  %v1805_v7 = vld [vmem:[#allocation5 + $0x104] ss:$8 sps:$4 sm:$0xff]   ;;  %v1803_v12 = vld [vmem:[#allocation5 + $0x100] ss:$8 sps:$4 sm:$0xff]   ;;  %v1809_v18 = vld [vmem:[#allocation5 + $0x110] ss:$8 sps:$4 sm:$0xff]   ;;  %p1996_p13 = por %p1995_p12, %p1994_p11 }
  0x51   :  { %v77_v8 = vld [vmem:[#allocation2 + $0x40] sm:$0xff]  ;;  %v1812_v19 = vld [vmem:[#allocation5 + $0x310] ss:$8 sps:$4 sm:$0xff]   ;;  %v1823_v24 = vld [vmem:[#allocation5 + $0x134] ss:$8 sps:$4 sm:$0xff]  }
  0x52   :  { %910 = vmatpush1.bf16.msra.mxu1 %v1747_v26  ;;  %v73_v9 = vld [vmem:[#allocation2 + $0x20] sm:$0xff]  ;;  %v101_v14 = vpack.c.bf16 %v77_v8, %v69_v6  ;;  %v1826_v25 = vld [vmem:[#allocation5 + $0x334] ss:$8 sps:$4 sm:$0xff]   ;;  %v1821_v26 = vld [vmem:[#allocation5 + $0x130] ss:$8 sps:$4 sm:$0xff]   ;;  %p1997_p0 = pnand %p1996_p13, %p1990_p10 }
  0x53   :  { %1016 = vmatpush1.bf16.msra.mxu0 %v1748_v27  ;;  %911 = vmatprep.subr.bf16.mxu1 %v1749_v28  ;;  %v81_v10 = vld [vmem:[#allocation2 + $0x60] sm:$0xff]  ;;  %v1824_v27 = vld [vmem:[#allocation5 + $0x330] ss:$8 sps:$4 sm:$0xff]   ;;  %v1847_v52 = vld [vmem:[#allocation5 + $0x174] ss:$8 sps:$4 sm:$0xff]  }
  0x54   :  { %1017 = vmatprep.subr.bf16.mxu0 %v1751_v29  ;;  %v1808_v11 = vld [vmem:[#allocation5 + $0x304] ss:$8 sps:$4 sm:$0xff]   ;;  %v1806_v13 = vld [vmem:[#allocation5 + $0x300] ss:$8 sps:$4 sm:$0xff]   ;;  %v105_v15 = vpack.c.bf16 %v81_v10, %v73_v9  ;;  %v1850_v53 = vld [vmem:[#allocation5 + $0x374] ss:$8 sps:$4 sm:$0xff]  }
  0x55   :  { %v1817_v20 = vld [vmem:[#allocation5 + $0x124] ss:$8 sps:$4 sm:$0xff]   ;;  %v1815_v22 = vld [vmem:[#allocation5 + $0x120] ss:$8 sps:$4 sm:$0xff]   ;;  %v72_v54 = vld [vmem:[#allocation2 + $0x18] sm:$0xff] }
  0x56   :  { %912 = vmatpush1.bf16.msra.mxu1 %v1753_v30  ;;  %v1820_v21 = vld [vmem:[#allocation5 + $0x324] ss:$8 sps:$4 sm:$0xff]   ;;  %v1818_v23 = vld [vmem:[#allocation5 + $0x320] ss:$8 sps:$4 sm:$0xff]   ;;  %v80_v55 = vld [vmem:[#allocation2 + $0x58] sm:$0xff] }
  0x57   :  { %1018 = vmatpush1.bf16.msra.mxu0 %v1754_v31  ;;  %913 = vmatprep.subr.bf16.mxu1 %v1755_v32  ;;  %v1829_v28 = vld [vmem:[#allocation5 + $0x144] ss:$8 sps:$4 sm:$0xff]   ;;  %v1827_v30 = vld [vmem:[#allocation5 + $0x140] ss:$8 sps:$4 sm:$0xff]   ;;  %v1835_v32 = vld [vmem:[#allocation5 + $0x154] ss:$8 sps:$4 sm:$0xff]  }
  0x58   :  { %1019 = vmatprep.subr.bf16.mxu0 %v1757_v33  ;;  %v1832_v29 = vld [vmem:[#allocation5 + $0x344] ss:$8 sps:$4 sm:$0xff]   ;;  %v1830_v31 = vld [vmem:[#allocation5 + $0x340] ss:$8 sps:$4 sm:$0xff]   ;;  %v1838_v33 = vld [vmem:[#allocation5 + $0x354] ss:$8 sps:$4 sm:$0xff]  }
  0x59   :  { %v97_v48 = vld [vmem:[#allocation2 + $0xe0] sm:$0xff]  ;;  %v1871_v10 = vld [vmem:[#allocation5 + $0x1b4] ss:$8 sps:$4 sm:$0xff]  }
  0x5a   :  { %914 = vmatpush1.bf16.msra.mxu1 %v1759_v34  ;;  %v1833_v34 = vld [vmem:[#allocation5 + $0x150] ss:$8 sps:$4 sm:$0xff]   ;;  %v1839_v49 = vld [vmem:[#allocation5 + $0x160] ss:$8 sps:$4 sm:$0xff]   ;;  %v1865_v6 = vld [vmem:[#allocation5 + $0x1a4] ss:$8 sps:$4 sm:$0xff]  }
  0x5b   :  { %1020 = vmatpush1.bf16.msra.mxu0 %v1760_v35  ;;  %915 = vmatprep.subr.bf16.mxu1 %v1761_v36  ;;  %v1836_v35 = vld [vmem:[#allocation5 + $0x350] ss:$8 sps:$4 sm:$0xff]   ;;  %v86_v36 = vld [vmem:[#allocation2 + $0x88] sm:$0xff] }
  0x5c   :  { %1021 = vmatprep.subr.bf16.mxu0 %v1763_v37  ;;  %v94_v37 = vld [vmem:[#allocation2 + $0xc8] sm:$0xff] }
  0x5d   :  { %v1863_v8 = vld [vmem:[#allocation5 + $0x1a0] ss:$8 sps:$4 sm:$0xff]  }
  0x5e   :  { %916 = vmatpush1.bf16.msra.mxu1 %v1765_v38  ;;  %v90_v38 = vld [vmem:[#allocation2 + $0xa8] sm:$0xff] }
  0x5f   :  { %1022 = vmatpush1.bf16.msra.mxu0 %v1766_v39  ;;  %917 = vmatprep.subr.bf16.mxu1 %v1767_v40  ;;  %v98_v39 = vld [vmem:[#allocation2 + $0xe8] sm:$0xff]  ;;  %v110_v40 = vpack.c.bf16 %v94_v37, %v86_v36  ;;  %v92_v36 = vld [vmem:[#allocation2 + $0xb8] sm:$0xff] }
  0x60   :  { %1023 = vmatprep.subr.bf16.mxu0 %v1769_v41  ;;  %v114_v41 = vpack.c.bf16 %v98_v39, %v90_v38  ;;  %v1866_v9 = vld [vmem:[#allocation5 + $0x3a0] ss:$8 sps:$4 sm:$0xff]   ;;  %v100_v37 = vld [vmem:[#allocation2 + $0xf8] sm:$0xff] }
  0x61   :  { %v1899_v38 = vld [vmem:[#allocation7 + $0x40] sm:$0xff]  }
  0x62   :  { %918 = vmatpush1.bf16.msra.mxu1 %v1771_v42  ;;  %v85_v42 = vld [vmem:[#allocation2 + $0x80] sm:$0xff] }
  0x63   :  { %1024 = vmatpush1.bf16.msra.mxu0 %v1772_v43  ;;  %919 = vmatprep.subr.bf16.mxu1 %v1773_v44  ;;  %v93_v43 = vld [vmem:[#allocation2 + $0xc0] sm:$0xff] }
  0x64   :  { %1025 = vmatprep.subr.bf16.mxu0 %v1775_v45  ;;  %v1841_v44 = vld [vmem:[#allocation5 + $0x164] ss:$8 sps:$4 sm:$0xff]  }
  0x65   :  { %v1844_v45 = vld [vmem:[#allocation5 + $0x364] ss:$8 sps:$4 sm:$0xff]  }
  0x66   :  { %920 = vmatpush1.bf16.msra.mxu1 %v1777_v46  ;;  %v109_v46 = vpack.c.bf16 %v93_v43, %v85_v42  ;;  %v116_v42 = vpack.c.bf16 %v100_v37, %v92_v36  ;;  %v1900_v43 = vld [vmem:[#allocation7] sm:$0xff]  }
  0x67   :  { %1026 = vmatpush1.bf16.msra.mxu0 %v1778_v47  ;;  %921 = vmatprep.subr.bf16.mxu1 %v1779_v50  ;;  %v89_v47 = vld [vmem:[#allocation2 + $0xa0] sm:$0xff] }
  0x68   :  { %1027 = vmatprep.subr.bf16.mxu0 %v1781_v51  ;;  %v1842_v50 = vld [vmem:[#allocation5 + $0x360] ss:$8 sps:$4 sm:$0xff]   ;;  %v113_v51 = vpack.c.bf16 %v97_v48, %v89_v47  ;;  %v91_v47 = vld [vmem:[#allocation2 + $0xb0] sm:$0xff] }
  0x69   :  { %v99_v48 = vld [vmem:[#allocation2 + $0xf0] sm:$0xff] }
  0x6a   :  { %922 = vmatpush1.bf16.msra.mxu1 %v1783_v56  ;;  %v76_v56 = vld [vmem:[#allocation2 + $0x38] sm:$0xff] }
  0x6b   :  { %1028 = vmatpush1.bf16.msra.mxu0 %v1784_v57  ;;  %923 = vmatprep.subr.bf16.mxu1 %v1785_v58  ;;  %v84_v57 = vld [vmem:[#allocation2 + $0x78] sm:$0xff] }
  0x6c   :  { %1029 = vmatprep.subr.bf16.mxu0 %v1787_v59  ;;  %v1845_v58 = vld [vmem:[#allocation5 + $0x170] ss:$8 sps:$4 sm:$0xff]  }
  0x6d   :  { %v1848_v59 = vld [vmem:[#allocation5 + $0x370] ss:$8 sps:$4 sm:$0xff]  }
  0x6e   :  { %924 = vmatpush1.bf16.msra.mxu1 %v1789_v60  ;;  %v104_v60 = vpack.c.bf16 %v80_v55, %v72_v54  ;;  %v1905_v54 = vld [vmem:[#allocation7 + $0x58] sm:$0xff]  }
  0x6f   :  { %1030 = vmatpush1.bf16.msra.mxu0 %v1790_v61  ;;  %925 = vmatprep.subr.bf16.mxu1 %v1791_v62  ;;  %v108_v61 = vpack.c.bf16 %v84_v57, %v76_v56  ;;  %v1853_v62 = vld [vmem:[#allocation5 + $0x184] ss:$8 sps:$4 sm:$0xff]   ;;  %v1906_v55 = vld [vmem:[#allocation7 + $0x18] sm:$0xff]  }
  0x70   :  { %1031 = vmatprep.subr.bf16.mxu0 %v1793_v63  ;;  %v1856_v63 = vld [vmem:[#allocation5 + $0x384] ss:$8 sps:$4 sm:$0xff]  }
  0x71   :  { %v1907_v56 = vld [vmem:[#allocation7 + $0x60] sm:$0xff]  }
  0x72   :  { %926 = vmatpush1.bf16.msra.mxu1 %v1795_v0  ;;  %v1851_v0 = vld [vmem:[#allocation5 + $0x180] ss:$8 sps:$4 sm:$0xff]  }
  0x73   :  { %1032 = vmatpush1.bf16.msra.mxu0 %v1796_v1  ;;  %927 = vmatprep.subr.bf16.mxu1 %v1797_v2  ;;  %v1854_v1 = vld [vmem:[#allocation5 + $0x380] ss:$8 sps:$4 sm:$0xff]   ;;  %v1859_v2 = vld [vmem:[#allocation5 + $0x194] ss:$8 sps:$4 sm:$0xff]  }
  0x74   :  { %1033 = vmatprep.subr.bf16.mxu0 %v1799_v3  ;;  %v1862_v3 = vld [vmem:[#allocation5 + $0x394] ss:$8 sps:$4 sm:$0xff]   ;;  %v1908_v57 = vld [vmem:[#allocation7 + $0x20] sm:$0xff]  }
  0x76   :  { %928 = vmatpush1.bf16.msra.mxu1 %v1801_v4  ;;  %v1857_v4 = vld [vmem:[#allocation5 + $0x190] ss:$8 sps:$4 sm:$0xff]  }
  0x77   :  { %1034 = vmatpush1.bf16.msra.mxu0 %v1802_v5  ;;  %950 = vmatprep.subr.bf16.mxu1 %v1805_v7  ;;  %v1860_v5 = vld [vmem:[#allocation5 + $0x390] ss:$8 sps:$4 sm:$0xff]   ;;  %v1868_v7 = vld [vmem:[#allocation5 + $0x3a4] ss:$8 sps:$4 sm:$0xff]  }
  0x78   :  { %1056 = vmatprep.subr.bf16.mxu0 %v1808_v11  ;;  %v1874_v11 = vld [vmem:[#allocation5 + $0x3b4] ss:$8 sps:$4 sm:$0xff]  }
  0x79   :  { %930 = vmatmul.mubr.bf16.vlgmr.msra.gmra.mrb[0].mxu1 %v101_v14  ;;  %v1877_v14 = vld [vmem:[#allocation5 + $0x1c4] ss:$8 sps:$4 sm:$0xff]  }
  0x7a   :  { %1036 = vmatmul.mubr.bf16.vlgmr.msra.gmra.mrb[0].mxu0 %v105_v15  ;;  %951 = vmatpush1.bf16.msra.mxu1 %v1803_v12  ;;  %v1869_v12 = vld [vmem:[#allocation5 + $0x1b0] ss:$8 sps:$4 sm:$0xff]   ;;  %v1880_v15 = vld [vmem:[#allocation5 + $0x3c4] ss:$8 sps:$4 sm:$0xff]  }
  0x7b   :  { %1057 = vmatpush1.bf16.msra.mxu0 %v1806_v13  ;;  %952 = vmatprep.subr.bf16.mxu1 %v1811_v16  ;;  %v1872_v13 = vld [vmem:[#allocation5 + $0x3b0] ss:$8 sps:$4 sm:$0xff]   ;;  %v1875_v16 = vld [vmem:[#allocation5 + $0x1c0] ss:$8 sps:$4 sm:$0xff]  }
  0x7c   :  { %1058 = vmatprep.subr.bf16.mxu0 %v1814_v17  ;;  %939 = vmatprep.mubr.bf16.mxu1 %v110_v40  ;;  %v1878_v17 = vld [vmem:[#allocation5 + $0x3c0] ss:$8 sps:$4 sm:$0xff]  }
  0x7d   :  { %1045 = vmatprep.mubr.bf16.mxu0 %v114_v41 }
  0x7e   :  { %953 = vmatpush1.bf16.msra.mxu1 %v1809_v18  ;;  %v1883_v18 = vld [vmem:[#allocation5 + $0x1d4] ss:$8 sps:$4 sm:$0xff]  }
  0x7f   :  { %1059 = vmatpush1.bf16.msra.mxu0 %v1812_v19  ;;  %954 = vmatprep.subr.bf16.mxu1 %v1817_v20  ;;  %v1886_v19 = vld [vmem:[#allocation5 + $0x3d4] ss:$8 sps:$4 sm:$0xff]   ;;  %v1881_v20 = vld [vmem:[#allocation5 + $0x1d0] ss:$8 sps:$4 sm:$0xff]  }
  0x80   :  { %1060 = vmatprep.subr.bf16.mxu0 %v1820_v21  ;;  %v1884_v21 = vld [vmem:[#allocation5 + $0x3d0] ss:$8 sps:$4 sm:$0xff]  }
  0x81   :  { %940 = vmatmul.mubr.bf16.gmra.mrb[4].mxu1 %v109_v46  ;;  %v95_v46 = vld [vmem:[#allocation2 + $0xd0] sm:$0xff] }
  0x82   :  { %955 = vmatpush1.bf16.msra.mxu1 %v1815_v22  ;;  %1046 = vmatmul.mubr.bf16.gmra.mrb[4].mxu0 %v113_v51  ;;  %v1889_v22 = vld [vmem:[#allocation5 + $0x1e4] ss:$8 sps:$4 sm:$0xff]  }
  0x83   :  { %1061 = vmatpush1.bf16.msra.mxu0 %v1818_v23  ;;  %956 = vmatprep.subr.bf16.mxu1 %v1823_v24  ;;  %v1892_v23 = vld [vmem:[#allocation5 + $0x3e4] ss:$8 sps:$4 sm:$0xff]   ;;  %v1887_v24 = vld [vmem:[#allocation5 + $0x1e0] ss:$8 sps:$4 sm:$0xff]  }
  0x84   :  { %1062 = vmatprep.subr.bf16.mxu0 %v1826_v25  ;;  %982 = vmatprep.mubr.bf16.mxu1 %v104_v60  ;;  %v1890_v25 = vld [vmem:[#allocation5 + $0x3e0] ss:$8 sps:$4 sm:$0xff]   ;;  %v1911_v60 = vld [vmem:[#allocation7 + $0x70] sm:$0xff]  }
  0x85   :  { %1088 = vmatprep.mubr.bf16.mxu0 %v108_v61  ;;  %v1912_v61 = vld [vmem:[#allocation7 + $0x30] sm:$0xff]  }
  0x86   :  { %957 = vmatpush1.bf16.msra.mxu1 %v1821_v26  ;;  %v1895_v26 = vld [vmem:[#allocation5 + $0x1f4] ss:$8 sps:$4 sm:$0xff]  }
  0x87   :  { %1063 = vmatpush1.bf16.msra.mxu0 %v1824_v27  ;;  %958 = vmatprep.subr.bf16.mxu1 %v1829_v28  ;;  %v1898_v27 = vld [vmem:[#allocation5 + $0x3f4] ss:$8 sps:$4 sm:$0xff]   ;;  %v1893_v28 = vld [vmem:[#allocation5 + $0x1f0] ss:$8 sps:$4 sm:$0xff]  }
  0x88   :  { %1064 = vmatprep.subr.bf16.mxu0 %v1832_v29  ;;  %v1896_v29 = vld [vmem:[#allocation5 + $0x3f0] ss:$8 sps:$4 sm:$0xff]  }
  0x8a   :  { %959 = vmatpush1.bf16.msra.mxu1 %v1827_v30  ;;  %v71_v30 = vld [vmem:[#allocation2 + $0x10] sm:$0xff] }
  0x8b   :  { %1065 = vmatpush1.bf16.msra.mxu0 %v1830_v31  ;;  %960 = vmatprep.subr.bf16.mxu1 %v1835_v32  ;;  %v79_v31 = vld [vmem:[#allocation2 + $0x50] sm:$0xff] }
  0x8c   :  { %1066 = vmatprep.subr.bf16.mxu0 %v1838_v33  ;;  %v75_v32 = vld [vmem:[#allocation2 + $0x30] sm:$0xff]  ;;  %v103_v39 = vpack.c.bf16 %v79_v31, %v71_v30 }
  0x8d   :  { %v83_v33 = vld [vmem:[#allocation2 + $0x70] sm:$0xff] }
  0x8e   :  { %961 = vmatpush1.bf16.msra.mxu1 %v1833_v34  ;;  %v88_v34 = vld [vmem:[#allocation2 + $0x98] sm:$0xff]  ;;  %v107_v40 = vpack.c.bf16 %v83_v33, %v75_v32 }
  0x8f   :  { %1067 = vmatpush1.bf16.msra.mxu0 %v1836_v35  ;;  %962 = vmatprep.subr.bf16.mxu1 %v1841_v44  ;;  %v96_v35 = vld [vmem:[#allocation2 + $0xd8] sm:$0xff]  ;;  %v1901_v44 = vld [vmem:[#allocation7 + $0x48] sm:$0xff]  }
  0x90   :  { %1068 = vmatprep.subr.bf16.mxu0 %v1844_v45  ;;  %v112_v41 = vpack.c.bf16 %v96_v35, %v88_v34  ;;  %v87_v45 = vld [vmem:[#allocation2 + $0x90] sm:$0xff] }
  0x91   :  { %v111_v51 = vpack.c.bf16 %v95_v46, %v87_v45 }
  0x92   :  { %963 = vmatpush1.bf16.msra.mxu1 %v1839_v49  ;;  %v1902_v49 = vld [vmem:[#allocation7 + $0x8] sm:$0xff]  }
  0x93   :  { %1069 = vmatpush1.bf16.msra.mxu0 %v1842_v50  ;;  %964 = vmatprep.subr.bf16.mxu1 %v1847_v52  ;;  %v1903_v50 = vld [vmem:[#allocation7 + $0x50] sm:$0xff]   ;;  %v115_v52 = vpack.c.bf16 %v99_v48, %v91_v47 }
  0x94   :  { %1070 = vmatprep.subr.bf16.mxu0 %v1850_v53  ;;  %v1904_v53 = vld [vmem:[#allocation7 + $0x10] sm:$0xff]  }
  0x96   :  { %965 = vmatpush1.bf16.msra.mxu1 %v1845_v58  ;;  %v1909_v58 = vld [vmem:[#allocation7 + $0x68] sm:$0xff]  }
  0x97   :  { %1071 = vmatpush1.bf16.msra.mxu0 %v1848_v59  ;;  %966 = vmatprep.subr.bf16.mxu1 %v1853_v62  ;;  %v1910_v59 = vld [vmem:[#allocation7 + $0x28] sm:$0xff]   ;;  %v1913_v62 = vld [vmem:[#allocation7 + $0x78] sm:$0xff]  }
  0x98   :  { %1072 = vmatprep.subr.bf16.mxu0 %v1856_v63  ;;  %v1914_v63 = vld [vmem:[#allocation7 + $0x38] sm:$0xff]  }
  0x9a   :  { %967 = vmatpush1.bf16.msra.mxu1 %v1851_v0  ;;  %v1915_v0 = vld [vmem:[%s2158_s5] sm:$0xff]  }
  0x9b   :  { %1073 = vmatpush1.bf16.msra.mxu0 %v1854_v1  ;;  %968 = vmatprep.subr.bf16.mxu1 %v1859_v2  ;;  %v1916_v1 = vld [vmem:[%s2158_s5 + $0x8] sm:$0xff]   ;;  %v1917_v2 = vld [vmem:[%s2158_s5 + $0x10] sm:$0xff]  }
  0x9c   :  { %1074 = vmatprep.subr.bf16.mxu0 %v1862_v3  ;;  %v247_v3 = vlaneseq }
  0x9e   :  { %969 = vmatpush1.bf16.msra.mxu1 %v1857_v4  ;;  %v248_v4 = vshrl.u32 %v247_v3, 7 }
  0x9f   :  { %1075 = vmatpush1.bf16.msra.mxu0 %v1860_v5  ;;  %970 = vmatprep.subr.bf16.mxu1 %v1865_v6  ;;  %v245_v6 = vld [vmem:[%s2155_s2] sm:$0x3] }
  0xa0   :  { %1076 = vmatprep.subr.bf16.mxu0 %v1868_v7  ;;  %v249_v5 = vsub.s32 0, %v248_v4  ;;  %v253_v7 = vsub.s32 1, %v248_v4 }
  0xa2   :  { %971 = vmatpush1.bf16.msra.mxu1 %v1863_v8  ;;  %v250_v8 = vrot.slane %v245_v6, %v249_v5 }
  0xa3   :  { %1077 = vmatpush1.bf16.msra.mxu0 %v1866_v9  ;;  %972 = vmatprep.subr.bf16.mxu1 %v1871_v10  ;;  %v254_v9 = vrot.slane %v245_v6, %v253_v7 }
  0xa4   :  { %1078 = vmatprep.subr.bf16.mxu0 %v1874_v11 }
  0xa6   :  { %973 = vmatpush1.bf16.msra.mxu1 %v1869_v12 }
  0xa7   :  { %1079 = vmatpush1.bf16.msra.mxu0 %v1872_v13  ;;  %974 = vmatprep.subr.bf16.mxu1 %v1877_v14 }
  0xa8   :  { %1080 = vmatprep.subr.bf16.mxu0 %v1880_v15 }
  0xaa   :  { %975 = vmatpush1.bf16.msra.mxu1 %v1875_v16 }
  0xab   :  { %1081 = vmatpush1.bf16.msra.mxu0 %v1878_v17  ;;  %976 = vmatprep.subr.bf16.mxu1 %v1883_v18 }
  0xac   :  { %1082 = vmatprep.subr.bf16.mxu0 %v1886_v19 }
  0xae   :  { %977 = vmatpush1.bf16.msra.mxu1 %v1881_v20 }
  0xaf   :  { %1083 = vmatpush1.bf16.msra.mxu0 %v1884_v21  ;;  %978 = vmatprep.subr.bf16.mxu1 %v1889_v22 }
  0xb0   :  { %1084 = vmatprep.subr.bf16.mxu0 %v1892_v23 }
  0xb2   :  { %979 = vmatpush1.bf16.msra.mxu1 %v1887_v24 }
  0xb3   :  { %1085 = vmatpush1.bf16.msra.mxu0 %v1890_v25  ;;  %980 = vmatprep.subr.bf16.mxu1 %v1895_v26 }
  0xb4   :  { %1086 = vmatprep.subr.bf16.mxu0 %v1898_v27 }
  0xb6   :  { %981 = vmatpush1.bf16.msra.mxu1 %v1893_v28 }
  0xb7   :  { %1087 = vmatpush1.bf16.msra.mxu0 %v1896_v29  ;;  %1646 = vmatprep.subr.bf16.mxu1 %v1915_v0 }
  0xb8   :  { %1608 = vmatprep.subr.bf16.mxu0 %v1899_v38 }
  0xb9   :  { %983 = vmatmul.mubr.bf16.vlgmr.msra.gmra.mrb[0].mxu1 %v103_v39 }
  0xba   :  { %1089 = vmatmul.mubr.bf16.vlgmr.msra.gmra.mrb[0].mxu0 %v107_v40  ;;  %992 = vmatprep.mubr.bf16.mxu1 %v112_v41 }
  0xbb   :  { %1098 = vmatprep.mubr.bf16.mxu0 %v116_v42  ;;  %1609 = vmatpush3.bf16.msra.mxu0 %v1900_v43 }
  0xbc   :  { %1610 = vmatprep.subr.bf16.mxu0 %v1901_v44  ;;  %1647 = vmatpush3.bf16.msra.mxu1 %v1915_v0 }
  0xbd   :  { %1648 = vmatprep.subr.bf16.mxu1 %v1916_v1 }
  0xbf   :  { %1611 = vmatpush3.bf16.msra.mxu0 %v1902_v49 }
  0xc0   :  { %1612 = vmatprep.subr.bf16.mxu0 %v1903_v50  ;;  %1649 = vmatpush3.bf16.msra.mxu1 %v1916_v1 }
  0xc1   :  { %993 = vmatmul.mubr.bf16.gmra.mrb[4].mxu1 %v111_v51  ;;  %1650 = vmatprep.subr.bf16.mxu1 %v1917_v2 }
  0xc2   :  { %1099 = vmatmul.mubr.bf16.gmra.mrb[4].mxu0 %v115_v52 }
  0xc3   :  { %1613 = vmatpush3.bf16.msra.mxu0 %v1904_v53 }
  0xc4   :  { %1614 = vmatprep.subr.bf16.mxu0 %v1905_v54  ;;  %1651 = vmatpush3.bf16.msra.mxu1 %v1917_v2  ;;  %v1918_v54 = vld [vmem:[%s2158_s5 + $0x18] sm:$0xff]  }
  0xc5   :  { %1652 = vmatprep.subr.bf16.mxu1 %v1918_v54 }
  0xc7   :  { %1615 = vmatpush3.bf16.msra.mxu0 %v1906_v55  ;;  %v1919_v55 = vld [vmem:[%s2158_s5 + $0x20] sm:$0xff]  }
  0xc8   :  { %1616 = vmatprep.subr.bf16.mxu0 %v1907_v56  ;;  %1653 = vmatpush3.bf16.msra.mxu1 %v1918_v54  ;;  %v1920_v56 = vld [vmem:[%s2158_s5 + $0x28] sm:$0xff]  }
  0xc9   :  { %1654 = vmatprep.subr.bf16.mxu1 %v1919_v55 }
  0xcb   :  { %1617 = vmatpush3.bf16.msra.mxu0 %v1908_v57  ;;  %v1921_v57 = vld [vmem:[%s2158_s5 + $0x30] sm:$0xff]  }
  0xcc   :  { %1618 = vmatprep.subr.bf16.mxu0 %v1909_v58  ;;  %1655 = vmatpush3.bf16.msra.mxu1 %v1919_v55  ;;  %v1922_v58 = vld [vmem:[%s2158_s5 + $0x38] sm:$0xff]  }
  0xcd   :  { %1656 = vmatprep.subr.bf16.mxu1 %v1920_v56 }
  0xcf   :  { %1619 = vmatpush3.bf16.msra.mxu0 %v1910_v59 }
  0xd0   :  { %1620 = vmatprep.subr.bf16.mxu0 %v1911_v60  ;;  %1657 = vmatpush3.bf16.msra.mxu1 %v1920_v56  ;;  %v1582_v60 = vld [vmem:[%s2157_s4] ss:$0 sm:$0xff] }
  0xd1   :  { %1658 = vmatprep.subr.bf16.mxu1 %v1921_v57 }
  0xd3   :  { %1621 = vmatpush3.bf16.msra.mxu0 %v1912_v61 }
  0xd4   :  { %1622 = vmatprep.subr.bf16.mxu0 %v1913_v62  ;;  %1659 = vmatpush3.bf16.msra.mxu1 %v1921_v57 }
  0xd5   :  { %1660 = vmatprep.subr.bf16.mxu1 %v1922_v58 }
  0xd7   :  { %1623 = vmatpush3.bf16.msra.mxu0 %v1914_v63 }
  0xd8   :  { %1661 = vmatpush3.bf16.msra.mxu1 %v1922_v58 }
 0x18c   :  { %v984_v10 = vpop.f32.mrb[0].mxu1 }
 0x18d   :  { %v1090_v11 = vpop.f32.mrb[0].mxu0  ;;  %v1666_v12 = vadd.f32 %v984_v10, %v250_v8  ;;  %v986_v13 = vpop.f32.mrb[1].mxu1 }
 0x18e   :  { %v1092_v14 = vpop.f32.mrb[1].mxu0  ;;  %v1668_v15 = vadd.f32 %v986_v13, %v254_v9  ;;  %v988_v16 = vpop.f32.mrb[2].mxu1 }
 0x18f   :  { %v1094_v17 = vpop.f32.mrb[2].mxu0  ;;  %v1667_v18 = vadd.f32 %v1666_v12, %v1090_v11  ;;  %v1670_v19 = vadd.f32 %v988_v16, %v250_v8  ;;  %v990_v20 = vpop.f32.mrb[3].mxu1 }
 0x190   :  { %v1096_v21 = vpop.f32.mrb[3].mxu0  ;;  %v1669_v22 = vadd.f32 %v1668_v15, %v1092_v14  ;;  %v1672_v23 = vadd.f32 %v990_v20, %v254_v9 }
 0x191   :  { %v1671_v24 = vadd.f32 %v1670_v19, %v1094_v17  ;;  %v1109_v26 = vmax.f32 %v1667_v18, 0.0  ;;  %v1599_v18 = vld [vmem:[%s2159_s6] ss:$0 sm:$0xff] }
 0x192   :  { %v1673_v25 = vadd.f32 %v1672_v23, %v1096_v21  ;;  %v1110_v28 = vmax.f32 %v1669_v22, 0.0 }
 0x193   :  { %v1111_v27 = vmax.f32 %v1671_v24, 0.0 }
 0x194   :  { %v1112_v29 = vmax.f32 %v1673_v25, 0.0  ;;  %v994_v30 = vpop.f32.mrb[4].mxu1 }
 0x195   :  { %v1100_v31 = vpop.f32.mrb[4].mxu0  ;;  %v1117_v32 = vpack.c.bf16 %v1111_v27, %v1109_v26  ;;  %v1674_v33 = vadd.f32 %v994_v30, %v250_v8  ;;  %v996_v34 = vpop.f32.mrb[5].mxu1 }
 0x196   :  { %v1102_v35 = vpop.f32.mrb[5].mxu0  ;;  %v1118_v36 = vpack.c.bf16 %v1112_v29, %v1110_v28  ;;  %v1676_v37 = vadd.f32 %v996_v34, %v254_v9  ;;  %v998_v38 = vpop.f32.mrb[6].mxu1 }
 0x197   :  { %v1104_v39 = vpop.f32.mrb[6].mxu0  ;;  %v1675_v40 = vadd.f32 %v1674_v33, %v1100_v31  ;;  %v1678_v41 = vadd.f32 %v998_v38, %v250_v8  ;;  %v1000_v42 = vpop.f32.mrb[7].mxu1 }
 0x198   :  { %v1106_v43 = vpop.f32.mrb[7].mxu0  ;;  %v1677_v44 = vadd.f32 %v1676_v37, %v1102_v35  ;;  %v1680_v45 = vadd.f32 %v1000_v42, %v254_v9  ;;  %1288 = vmatprep.mubr.bf16.mxu0 %v1118_v36 }
 0x199   :  { %v1679_v46 = vadd.f32 %v1678_v41, %v1104_v39  ;;  %1289 = vmatmul.mubr.bf16.vlgmr.msra.gmra.mrb[8].mxu0 %v1117_v32  ;;  %v1113_v48 = vmax.f32 %v1675_v40, 0.0 }
 0x19a   :  { %v1681_v47 = vadd.f32 %v1680_v45, %v1106_v43  ;;  %v1114_v50 = vmax.f32 %v1677_v44, 0.0 }
 0x19b   :  { %v1115_v49 = vmax.f32 %v1679_v46, 0.0 }
 0x19c   :  { %v1116_v51 = vmax.f32 %v1681_v47, 0.0 }
 0x19d   :  { %v1119_v52 = vpack.c.bf16 %v1115_v49, %v1113_v48 }
 0x19e   :  { %v1120_v53 = vpack.c.bf16 %v1116_v51, %v1114_v50 }
 0x1a0   :  { %1296 = vmatprep.mubr.bf16.mxu0 %v1120_v53 }
 0x1a1   :  { %1297 = vmatmul.mubr.bf16.gmra.mrb[12].mxu0 %v1119_v52 }
 0x26c   :  { %v1624_v59 = vpop.f32.mrb[8].mxu0 }
 0x26d   :  { %v1625_v61 = vpop.f32.mrb[9].mxu0 }
 0x26e   :  { %v1626_v62 = vadd.f32 %v1625_v61, %v1624_v59  ;;  %v1627_v63 = vpop.f32.mrb[10].mxu0 }
 0x26f   :  { %v1628_v0 = vpop.f32.mrb[11].mxu0 }
 0x270   :  { %v1291_v1 = vadd.f32 %v1626_v62, %v1582_v60  ;;  %v1629_v2 = vadd.f32 %v1628_v0, %v1627_v63 }
 0x272   :  { %v1294_v3 = vadd.f32 %v1629_v2, %v1582_v60  ;;  %v1305_v4 = vmax.f32 %v1291_v1, 0.0 }
 0x274   :  { %v1306_v5 = vmax.f32 %v1294_v3, 0.0  ;;  %v1630_v6 = vpop.f32.mrb[12].mxu0 }
 0x275   :  { %v1631_v7 = vpop.f32.mrb[13].mxu0 }
 0x276   :  { %v1632_v8 = vadd.f32 %v1631_v7, %v1630_v6  ;;  %v1633_v9 = vpop.f32.mrb[14].mxu0  ;;  %v1309_v10 = vpack.c.bf16 %v1306_v5, %v1305_v4 }
 0x277   :  { %v1634_v11 = vpop.f32.mrb[15].mxu0 }
 0x278   :  { %v1299_v12 = vadd.f32 %v1632_v8, %v1582_v60  ;;  %v1635_v13 = vadd.f32 %v1634_v11, %v1633_v9  ;;  %1662 = vmatprep.mubr.bf16.mxu1 %v1309_v10 }
 0x27a   :  { %v1302_v14 = vadd.f32 %v1635_v13, %v1582_v60  ;;  %v1307_v15 = vmax.f32 %v1299_v12, 0.0 }
 0x27c   :  { %v1308_v16 = vmax.f32 %v1302_v14, 0.0 }
 0x27e   :  { %v1310_v17 = vpack.c.bf16 %v1308_v16, %v1307_v15 }
 0x280   :  { %1663 = vmatmul.mubr.bf16.vlgmr.msra.gmra.mrb[8].mxu1 %v1310_v17 }
 0x353   :  { %v1664_v19 = vpop.f32.mrb[8].mxu1 }
 0x354   :  { %v1425_v20 = vadd.f32 %v1664_v19, %v1599_v18  ;;  %v1416_v21 = vpop.f32.mrb[9].mxu1 }
 0x355   :  { %v1417_v22 = vadd.f32 %v1599_v18, %v1416_v21  ;;  %v1665_v23 = vpop.f32.mrb[10].mxu1 }
 0x356   :  { %1434 = vst.msk [vmem:[#allocation8 + $0x10] sm:$0xff] %vm1431_vm0, %v1425_v20  ;;  %v1428_v24 = vadd.f32 %v1665_v23, %v1599_v18  ;;  %v1419_v25 = vpop.f32.mrb[11].mxu1 }
 0x357   :  { %1432 = vst.msk [vmem:[#allocation8] sm:$0xff] %vm1431_vm0, %v1417_v22  ;;  %v1420_v26 = vadd.f32 %v1599_v18, %v1419_v25 }
 0x358   :  { %1435 = vst.msk [vmem:[#allocation8 + $0x18] sm:$0xff] %vm1431_vm0, %v1428_v24 }
 0x359   :  { %1433 = vst.msk [vmem:[#allocation8 + $0x8] sm:$0xff] %vm1431_vm0, %v1420_v26 }
 0x35a   :  { %2000 = shalt.err (!%p1997_p0)
}
 0x35b   :  { %s2001_s18 = scalar_lea.hbm %s2160_s7, 512 }
 0x35c   :  { %p2002_p1 = scmp.ne.s32.totalorder %s2160_s7, %s2001_s18  ;;  %p2005_p2 = scmp.lt.u32.totalorder %s2001_s18, %s2160_s7 }
 0x35e   :  { %p2007_p3 = pnand %p2005_p2, %p2002_p1 }
 0x360   :  { %2010 = shalt.err (!%p2007_p3)
}
 0x361   :  { %1447 = dma.vmem_to_hbm [thread:$0]  %s1442_s17, 512, %s2160_s7, [#allocation4], %s2018_s11, %s2018_s11, %s2019_s12  }
 0x362   :  { %2015 = dma.done.wait [#allocation4], 512  }
 0x363   :  { %2016 = vsyncadd [#allocation4], 4294966784 }
 0x364   :  { %1451 = vsyncpa [#allocation3], 1 }
 0x365   :  { %1452 = vsyncpa [#allocation6], 1 }
 0x366   :  { %1453 = vsyncpa [#allocation4], 1 }

</bundles_post_ra>
